<compile_context>
chip_gen: v7x
topology: tpu7x:2x2x1
jax: 0.10.0
libtpu: 0.0.40
codegen_flags: <defaults>
</compile_context>

<pallas_src>
import math

import jax
import jax.numpy as jnp
from jax import lax
from jax.experimental import pallas as pl
from jax.experimental.pallas import tpu as pltpu

_LANES = 128


def _round_up(x, n):
    return ((x + n - 1) // n) * n


def _vmem_budget_bytes():
    """~70% of per-core VMEM; conservative 64 MiB fallback (fits every gen)."""
    cap = 64 * 1024 * 1024
    try:
        info_cap = int(pltpu.get_tpu_info().vmem_capacity_bytes)
        if info_cap > 0:
            cap = info_cap
    except Exception:
        pass
    budget = int(cap * 0.7)
    return max(16 * 1024 * 1024, min(budget, 100 * 1024 * 1024))


def _estimate_vmem_bytes(tm, tn, D):
    # double-buffered x / W / wf / lrow / labels blocks + xn / accumulator scratch
    return 4 * (2 * tm * D            # x in (x2)
                + 2 * tn * D          # W in (x2)
                + 2 * tm * tn         # wf out (x2)
                + 4 * tm * _LANES     # lrow out (x2) + labels in (x2, lane-padded)
                + tm * D              # xn scratch
                + 2 * tm * _LANES)    # sumexcl + target scratch


def _pick_tiles(B, C, D, budget):
    # Big batch tiles first: the W stream (C*D*4 bytes per batch tile) is the
    # dominant HBM term on v5e/v6e, so shrink tn before tm when VMEM-tight.
    tm = min(256, _round_up(B, 8))
    tn = min(1024, _round_up(C, _LANES))
    while tn > _LANES and _estimate_vmem_bytes(tm, tn, D) > budget:
        tn -= _LANES
    while tm > 8 and _estimate_vmem_bytes(tm, tn, D) > budget:
        tm -= 8
    return tm, tn


def _make_arcloss_kernel(*, s, m, eps, B, C, Cp, tm, tn):
    cos_m = math.cos(m)
    sin_m = math.sin(m)
    n_pad_classes = Cp - C          # padded classes each add exp(0)=1 to the sum
    n_strips = tn // _LANES

    def kernel(x_ref, w_ref, labels_ref, wf_ref, lrow_ref,
               xn_ref, sumexcl_ref, target_ref):
        i = pl.program_id(0)        # batch tile  ("parallel")
        j = pl.program_id(1)        # class tile  ("arbitrary", reduction, last)
        nj = pl.num_programs(1)
        D = x_ref.shape[1]
        zero_start = max(D - 48, 0)

        # ---- first class tile: normalize x rows once, init accumulators ----
        @pl.when(j == 0)
        def _():
            xt = x_ref[...]                                          # (tm, D)
            sumsq = jnp.sum(xt * xt, axis=1, keepdims=True)
            # rsqrt(max(sumsq, 1e-24)) == 1 / max(||x||, 1e-12)  (F.normalize)
            inv = lax.rsqrt(jnp.maximum(sumsq, 1e-24))
            xn_ref[...] = xt * inv
            sumexcl_ref[...] = jnp.zeros_like(sumexcl_ref)
            target_ref[...] = jnp.zeros_like(target_ref)

        # ---- x[0, -48:] = 0 : only global row 0 (first batch tile) ----
        @pl.when(jnp.logical_and(i == 0, j == 0))
        def _():
            col = lax.broadcasted_iota(jnp.int32, (1, D), 1)
            row0 = xn_ref[0:1, :]
            xn_ref[0:1, :] = jnp.where(col >= zero_start, 0.0, row0)

        # ---- wf tile = x_n @ W_tile.T (contract on D; no wrapper transpose) --
        xn = xn_ref[...]                                             # (tm, D)
        wf_tile = lax.dot_general(xn, w_ref[...], (((1,), (1,)), ((), ())),
                                  preferred_element_type=jnp.float32)  # (tm, tn)
        wf_ref[...] = wf_tile

        # ---- accumulate target logit and sum_{j != label} exp(s*wf) ----
        # class-index compare from a (1, tn) iota + scalar base vs (tm,1) labels
        lab = labels_ref[...]                                        # (tm, 1) int32
        cls_row = j * tn + lax.broadcasted_iota(jnp.int32, (1, tn), 1)
        onehot = cls_row == lab                                      # (tm, tn)

        expv = jnp.exp(s * wf_tile)
        excl = jnp.where(onehot, 0.0, expv)       # padded classes contribute 1
        tgt = jnp.where(onehot, wf_tile, 0.0)

        # lane-dense accumulation: dense VPU adds of 128-wide lane strips;
        # the cross-lane reduce happens once, in the finalize.
        sum_acc = sumexcl_ref[...]
        tgt_acc = target_ref[...]
        for k in range(n_strips):
            sl = slice(k * _LANES, (k + 1) * _LANES)
            sum_acc = sum_acc + excl[:, sl]
            tgt_acc = tgt_acc + tgt[:, sl]
        sumexcl_ref[...] = sum_acc
        target_ref[...] = tgt_acc

        # ---- last class tile: finalize per-row loss ----
        @pl.when(j == nj - 1)
        def _():
            sum_excl = (jnp.sum(sumexcl_ref[...], axis=1, keepdims=True)
                        - float(n_pad_classes))                      # drop pad classes
            t = jnp.sum(target_ref[...], axis=1, keepdims=True)
            t = jnp.clip(t, -1.0 + eps, 1.0 - eps)
            # cos(acos(t) + m) = t*cos(m) - sqrt(1 - t^2)*sin(m)
            num = s * (t * cos_m - jnp.sqrt(1.0 - t * t) * sin_m)    # (tm, 1)
            denom = jnp.exp(num) + sum_excl
            L = num - jnp.log(denom)
            row = i * tm + lax.broadcasted_iota(jnp.int32, (tm, 1), 0)
            L = jnp.where(row < B, L, 0.0)                           # drop pad rows
            lrow_ref[...] = jnp.broadcast_to(L, lrow_ref.shape)      # lane-dense out

    return kernel


def arcloss_forward(x, W, labels, *, s=64.0, m=0.5, eps=1e-7,
                    tm=None, tn=None, vmem_limit_bytes=None):
    """x: (B, D) f32, W: (C, D) f32 (nn.Linear weight, raw), labels: (B,) int.

    Returns (wf, loss) exactly as the PyTorch ArcLoss forward.
    Default tiles: tm up to 256 over batch, tn up to 1024 over classes, both
    auto-shrunk to ~70% of the detected per-core VMEM.  On v7x prefer a tm
    that yields >= 2 batch tiles so both TensorCores get work.
    """
    B, D = x.shape
    C = W.shape[0]

    budget = _vmem_budget_bytes()
    if tm is None or tn is None:
        auto_tm, auto_tn = _pick_tiles(B, C, D, budget)
        tm = auto_tm if tm is None else tm
        tn = auto_tn if tn is None else tn
    if vmem_limit_bytes is None:
        vmem_limit_bytes = budget

    Bp = _round_up(B, tm)
    Cp = _round_up(C, tn)

    x_p = jnp.pad(x.astype(jnp.float32), ((0, Bp - B), (0, 0)))
    # Padded W rows MUST be exact zeros: each padded class then contributes
    # exp(0) = 1 to the exclusion sum, removed as the constant (Cp - C).
    W_p = jnp.pad(W.astype(jnp.float32), ((0, Cp - C), (0, 0)))
    labels_p = jnp.pad(labels.astype(jnp.int32), (0, Bp - B)).reshape(Bp, 1)

    grid = (Bp // tm, Cp // tn)
    kernel = _make_arcloss_kernel(s=s, m=m, eps=eps, B=B, C=C, Cp=Cp, tm=tm, tn=tn)

    cost = pl.CostEstimate(
        flops=2 * Bp * Cp * D,
        transcendentals=Bp * Cp + 4 * Bp,
        bytes_accessed=4 * (Bp * D + (Bp // tm) * Cp * D + Bp * Cp + Bp * _LANES),
    )

    wf_p, l_rows = pl.pallas_call(
        kernel,
        out_shape=(
            jax.ShapeDtypeStruct((Bp, Cp), jnp.float32),     # wf (f32: interface)
            jax.ShapeDtypeStruct((Bp, _LANES), jnp.float32), # per-row L (lane-dense)
        ),
        grid_spec=pltpu.PrefetchScalarGridSpec(
            num_scalar_prefetch=0,
            grid=grid,
            in_specs=[
                pl.BlockSpec((tm, D), lambda i, j: (i, 0)),    # x (resident over j)
                pl.BlockSpec((tn, D), lambda i, j: (j, 0)),    # W row-tile (streamed)
                pl.BlockSpec((tm, 1), lambda i, j: (i, 0)),    # labels
            ],
            out_specs=(
                pl.BlockSpec((tm, tn), lambda i, j: (i, j)),   # wf tile
                pl.BlockSpec((tm, _LANES), lambda i, j: (i, 0)),  # L rows (resident)
            ),
            scratch_shapes=[
                pltpu.VMEM((tm, D), jnp.float32),       # normalized x tile
                pltpu.VMEM((tm, _LANES), jnp.float32),  # lane-dense sum_{j!=label} exp
                pltpu.VMEM((tm, _LANES), jnp.float32),  # lane-dense target logit
            ],
        ),
        compiler_params=pltpu.CompilerParams(
            dimension_semantics=("parallel", "arbitrary"),
            vmem_limit_bytes=int(vmem_limit_bytes)),
        cost_estimate=cost,
    )(x_p, W_p, labels_p)

    wf = wf_p[:B, :C]
    loss = -jnp.sum(l_rows[:B, 0]) / B
    return wf, loss


def arcloss_ref(x, W, labels, *, s=64.0, m=0.5, eps=1e-7):
    """Pure-JAX reference mirroring the PyTorch forward (exact exclusion)."""
    B, D = x.shape
    C = W.shape[0]
    xn = x / jnp.maximum(jnp.linalg.norm(x, axis=1, keepdims=True), 1e-12)
    start = max(D - 48, 0)
    xn = xn.at[0, start:].set(0.0)
    wf = xn @ W.T
    target = wf[jnp.arange(B), labels]
    t = jnp.clip(target, -1.0 + eps, 1.0 - eps)
    num = s * jnp.cos(jnp.arccos(t) + m)
    onehot = jax.nn.one_hot(labels, C, dtype=jnp.bool_)
    sum_excl = jnp.sum(jnp.where(onehot, 0.0, jnp.exp(s * wf)), axis=1)
    denom = jnp.exp(num) + sum_excl
    L = num - jnp.log(denom)
    return wf, -jnp.mean(L)


if __name__ == "__main__":
    # Small but non-trivial shapes: batch and class counts NOT tile-aligned so
    # the padding/masking and constant pad-subtraction paths are exercised;
    # tm=8 / tn=128 gives a (2, 3) grid (2 batch tiles x 3 class tiles).
    B, D, C = 13, 64, 300

    key = jax.random.PRNGKey(0)
    kx, kw, kl = jax.random.split(key, 3)

    x = jax.random.normal(kx, (B, D), dtype=jnp.float32)
    # nn.Linear weight init: uniform(-1/sqrt(in), 1/sqrt(in)), shape (out, in)
    bound = 1.0 / math.sqrt(D)
    W = jax.random.uniform(kw, (C, D), dtype=jnp.float32, minval=-bound, maxval=bound)
    labels = jax.random.randint(kl, (B,), 0, C, dtype=jnp.int32)

    wf, loss = arcloss_forward(x, W, labels, tm=8, tn=128)
    jax.block_until_ready((wf, loss))

    wf_r, loss_r = arcloss_ref(x, W, labels)
    assert jnp.allclose(wf, wf_r, rtol=1e-4, atol=1e-4), "wf mismatch"
    assert jnp.allclose(loss, loss_r, rtol=1e-3, atol=1e-3), "loss mismatch"

    print("KERNEL_OK")
</pallas_src>

<mosaic_0001>
module attributes {stable_mosaic.version = 11 : i64} {
  func.func @kernel(%arg0: i32, %arg1: i32, %arg2: memref<8x64xf32, #tpu.memory_space<vmem>>, %arg3: memref<128x64xf32, #tpu.memory_space<vmem>>, %arg4: memref<8x1xi32, #tpu.memory_space<vmem>>, %arg5: memref<8x128xf32, #tpu.memory_space<vmem>>, %arg6: memref<8x128xf32, #tpu.memory_space<vmem>>, %arg7: memref<8x64xf32, #tpu.memory_space<vmem>>, %arg8: memref<8x128xf32, #tpu.memory_space<vmem>>, %arg9: memref<8x128xf32, #tpu.memory_space<vmem>>) attributes {dimension_semantics = [#tpu.dimension_semantics<parallel>, #tpu.dimension_semantics<arbitrary>], iteration_bounds = array<i64: 2, 3>, scalar_prefetch = 0 : i64, scratch_operands = 3 : i64, tpu.core_type = #tpu.core_type<tc>, window_params = [{transform_indices = @transform_0, window_bounds = array<i64: 8, 64>}, {transform_indices = @transform_1, window_bounds = array<i64: 128, 64>}, {transform_indices = @transform_2, window_bounds = array<i64: 8, 1>}, {transform_indices = @transform_3, window_bounds = array<i64: 8, 128>}, {transform_indices = @transform_4, window_bounds = array<i64: 8, 128>}]} {
    %c0_i32 = arith.constant 0 : i32
    %0 = arith.cmpi eq, %arg1, %c0_i32 : i32
    %1 = arith.extui %0 : i1 to i32
    %c0_i32_0 = arith.constant 0 : i32
    %2 = arith.cmpi ne, %1, %c0_i32_0 : i32
    scf.if %2 {
      %c0_23 = arith.constant 0 : index
      %c0_24 = arith.constant 0 : index
      %36 = vector.load %arg2[%c0_23, %c0_24] : memref<8x64xf32, #tpu.memory_space<vmem>>, vector<8x64xf32>
      %37 = arith.mulf %36, %36 : vector<8x64xf32>
      %cst_25 = arith.constant dense<0.000000e+00> : vector<8xf32>
      %38 = vector.multi_reduction <add>, %37, %cst_25 [1] : vector<8x64xf32> to vector<8xf32>
      %39 = vector.shape_cast %38 : vector<8xf32> to vector<8x1xf32>
      %cst_26 = arith.constant 1.000000e-24 : f32
      %40 = vector.broadcast %cst_26 : f32 to vector<8x1xf32>
      %41 = arith.maximumf %39, %40 : vector<8x1xf32>
      %42 = math.rsqrt %41 : vector<8x1xf32>
      %43 = vector.broadcast %42 : vector<8x1xf32> to vector<8x64xf32>
      %44 = arith.mulf %36, %43 : vector<8x64xf32>
      %c0_27 = arith.constant 0 : index
      %c0_28 = arith.constant 0 : index
      %45 = vector.load %arg7[%c0_27, %c0_28] : memref<8x64xf32, #tpu.memory_space<vmem>>, vector<8x64xf32>
      tpu.vector_store %arg7[%c0_27, %c0_28], %44 {strides = array<i32>} : memref<8x64xf32, #tpu.memory_space<vmem>>, vector<8x64xf32>,
      %cst_29 = arith.constant 0.000000e+00 : f32
      %46 = vector.broadcast %cst_29 : f32 to vector<8x128xf32>
      %c0_30 = arith.constant 0 : index
      %c0_31 = arith.constant 0 : index
      %47 = vector.load %arg8[%c0_30, %c0_31] : memref<8x128xf32, #tpu.memory_space<vmem>>, vector<8x128xf32>
      tpu.vector_store %arg8[%c0_30, %c0_31], %46 {strides = array<i32>} : memref<8x128xf32, #tpu.memory_space<vmem>>, vector<8x128xf32>,
      %cst_32 = arith.constant 0.000000e+00 : f32
      %48 = vector.broadcast %cst_32 : f32 to vector<8x128xf32>
      %c0_33 = arith.constant 0 : index
      %c0_34 = arith.constant 0 : index
      %49 = vector.load %arg9[%c0_33, %c0_34] : memref<8x128xf32, #tpu.memory_space<vmem>>, vector<8x128xf32>
      tpu.vector_store %arg9[%c0_33, %c0_34], %48 {strides = array<i32>} : memref<8x128xf32, #tpu.memory_space<vmem>>, vector<8x128xf32>,
    } else {
    }
    %c0_i32_1 = arith.constant 0 : i32
    %3 = arith.cmpi eq, %arg0, %c0_i32_1 : i32
    %c0_i32_2 = arith.constant 0 : i32
    %4 = arith.cmpi eq, %arg1, %c0_i32_2 : i32
    %5 = arith.andi %3, %4 : i1
    %6 = arith.extui %5 : i1 to i32
    %c0_i32_3 = arith.constant 0 : i32
    %7 = arith.cmpi ne, %6, %c0_i32_3 : i32
    scf.if %7 {
      %36 = tpu.iota {dimensions = array<i32: 1>} : vector<1x64xi32>
      %c0_23 = arith.constant 0 : index
      %c0_24 = arith.constant 0 : index
      %37 = vector.load %arg7[%c0_23, %c0_24] : memref<8x64xf32, #tpu.memory_space<vmem>>, vector<1x64xf32>
      %c16_i32 = arith.constant 16 : i32
      %38 = vector.broadcast %c16_i32 : i32 to vector<1x64xi32>
      %39 = arith.cmpi sge, %36, %38 : vector<1x64xi32>
      %cst_25 = arith.constant 0.000000e+00 : f32
      %40 = vector.broadcast %cst_25 : f32 to vector<1x64xf32>
      %41 = arith.select %39, %40, %37 : vector<1x64xi1>, vector<1x64xf32>
      %c0_26 = arith.constant 0 : index
      %c0_27 = arith.constant 0 : index
      %42 = vector.load %arg7[%c0_26, %c0_27] : memref<8x64xf32, #tpu.memory_space<vmem>>, vector<1x64xf32>
      tpu.vector_store %arg7[%c0_26, %c0_27], %41 {strides = array<i32>} : memref<8x64xf32, #tpu.memory_space<vmem>>, vector<1x64xf32>,
    } else {
    }
    %c0 = arith.constant 0 : index
    %c0_4 = arith.constant 0 : index
    %8 = vector.load %arg7[%c0, %c0_4] : memref<8x64xf32, #tpu.memory_space<vmem>>, vector<8x64xf32>
    %c0_5 = arith.constant 0 : index
    %c0_6 = arith.constant 0 : index
    %9 = vector.load %arg3[%c0_5, %c0_6] : memref<128x64xf32, #tpu.memory_space<vmem>>, vector<128x64xf32>
    %cst = arith.constant dense<0.000000e+00> : vector<8x128xf32>
    %10 = tpu.matmul %8, %9, %cst {dimension_numbers = #tpu.dot_dimension_numbers<[1], [1], [0], [0], [0, 0, 1, 0], [], []>} : vector<8x64xf32>, vector<128x64xf32>, vector<8x128xf32> -> vector<8x128xf32>
    %c0_7 = arith.constant 0 : index
    %c0_8 = arith.constant 0 : index
    %11 = vector.load %arg5[%c0_7, %c0_8] : memref<8x128xf32, #tpu.memory_space<vmem>>, vector<8x128xf32>
    tpu.vector_store %arg5[%c0_7, %c0_8], %10 {strides = array<i32>} : memref<8x128xf32, #tpu.memory_space<vmem>>, vector<8x128xf32>,
    %c0_9 = arith.constant 0 : index
    %c0_10 = arith.constant 0 : index
    %12 = vector.load %arg4[%c0_9, %c0_10] : memref<8x1xi32, #tpu.memory_space<vmem>>, vector<8x1xi32>
    %c128_i32 = arith.constant 128 : i32
    %13 = arith.muli %arg1, %c128_i32 : i32
    %14 = tpu.iota {dimensions = array<i32: 1>} : vector<1x128xi32>
    %15 = vector.broadcast %13 : i32 to vector<1x128xi32>
    %16 = arith.addi %15, %14 : vector<1x128xi32>
    %17 = vector.broadcast %16 : vector<1x128xi32> to vector<8x128xi32>
    %18 = vector.broadcast %12 : vector<8x1xi32> to vector<8x128xi32>
    %19 = arith.cmpi eq, %17, %18 : vector<8x128xi32>
    %cst_11 = arith.constant 6.400000e+01 : f32
    %20 = vector.broadcast %cst_11 : f32 to vector<8x128xf32>
    %21 = arith.mulf %20, %10 : vector<8x128xf32>
    %22 = math.exp %21 : vector<8x128xf32>
    %cst_12 = arith.constant 0.000000e+00 : f32
    %23 = vector.broadcast %cst_12 : f32 to vector<8x128xf32>
    %24 = arith.select %19, %23, %22 : vector<8x128xi1>, vector<8x128xf32>
    %cst_13 = arith.constant 0.000000e+00 : f32
    %25 = vector.broadcast %cst_13 : f32 to vector<8x128xf32>
    %26 = arith.select %19, %10, %25 : vector<8x128xi1>, vector<8x128xf32>
    %c0_14 = arith.constant 0 : index
    %c0_15 = arith.constant 0 : index
    %27 = vector.load %arg8[%c0_14, %c0_15] : memref<8x128xf32, #tpu.memory_space<vmem>>, vector<8x128xf32>
    %c0_16 = arith.constant 0 : index
    %c0_17 = arith.constant 0 : index
    %28 = vector.load %arg9[%c0_16, %c0_17] : memref<8x128xf32, #tpu.memory_space<vmem>>, vector<8x128xf32>
    %29 = arith.addf %27, %24 : vector<8x128xf32>
    %30 = arith.addf %28, %26 : vector<8x128xf32>
    %c0_18 = arith.constant 0 : index
    %c0_19 = arith.constant 0 : index
    %31 = vector.load %arg8[%c0_18, %c0_19] : memref<8x128xf32, #tpu.memory_space<vmem>>, vector<8x128xf32>
    tpu.vector_store %arg8[%c0_18, %c0_19], %29 {strides = array<i32>} : memref<8x128xf32, #tpu.memory_space<vmem>>, vector<8x128xf32>,
    %c0_20 = arith.constant 0 : index
    %c0_21 = arith.constant 0 : index
    %32 = vector.load %arg9[%c0_20, %c0_21] : memref<8x128xf32, #tpu.memory_space<vmem>>, vector<8x128xf32>
    tpu.vector_store %arg9[%c0_20, %c0_21], %30 {strides = array<i32>} : memref<8x128xf32, #tpu.memory_space<vmem>>, vector<8x128xf32>,
    %c2_i32 = arith.constant 2 : i32
    %33 = arith.cmpi eq, %arg1, %c2_i32 : i32
    %34 = arith.extui %33 : i1 to i32
    %c0_i32_22 = arith.constant 0 : i32
    %35 = arith.cmpi ne, %34, %c0_i32_22 : i32
    scf.if %35 {
      %c0_23 = arith.constant 0 : index
      %c0_24 = arith.constant 0 : index
      %36 = vector.load %arg8[%c0_23, %c0_24] : memref<8x128xf32, #tpu.memory_space<vmem>>, vector<8x128xf32>
      %cst_25 = arith.constant dense<0.000000e+00> : vector<8xf32>
      %37 = vector.multi_reduction <add>, %36, %cst_25 [1] : vector<8x128xf32> to vector<8xf32>
      %38 = vector.shape_cast %37 : vector<8xf32> to vector<8x1xf32>
      %cst_26 = arith.constant 8.400000e+01 : f32
      %39 = vector.broadcast %cst_26 : f32 to vector<8x1xf32>
      %40 = arith.subf %38, %39 : vector<8x1xf32>
      %c0_27 = arith.constant 0 : index
      %c0_28 = arith.constant 0 : index
      %41 = vector.load %arg9[%c0_27, %c0_28] : memref<8x128xf32, #tpu.memory_space<vmem>>, vector<8x128xf32>
      %cst_29 = arith.constant dense<0.000000e+00> : vector<8xf32>
      %42 = vector.multi_reduction <add>, %41, %cst_29 [1] : vector<8x128xf32> to vector<8xf32>
      %43 = vector.shape_cast %42 : vector<8xf32> to vector<8x1xf32>
      %cst_30 = arith.constant -0.99999988 : f32
      %cst_31 = arith.constant 0.99999988 : f32
      %44 = vector.broadcast %cst_30 : f32 to vector<8x1xf32>
      %45 = arith.maximumf %44, %43 : vector<8x1xf32>
      %46 = vector.broadcast %cst_31 : f32 to vector<8x1xf32>
      %47 = arith.minimumf %46, %45 : vector<8x1xf32>
      %cst_32 = arith.constant 0.87758255 : f32
      %48 = vector.broadcast %cst_32 : f32 to vector<8x1xf32>
      %49 = arith.mulf %47, %48 : vector<8x1xf32>
      %50 = arith.mulf %47, %47 : vector<8x1xf32>
      %cst_33 = arith.constant 1.000000e+00 : f32
      %51 = vector.broadcast %cst_33 : f32 to vector<8x1xf32>
      %52 = arith.subf %51, %50 : vector<8x1xf32>
      %53 = math.sqrt %52 : vector<8x1xf32>
      %cst_34 = arith.constant 0.47942555 : f32
      %54 = vector.broadcast %cst_34 : f32 to vector<8x1xf32>
      %55 = arith.mulf %53, %54 : vector<8x1xf32>
      %56 = arith.subf %49, %55 : vector<8x1xf32>
      %cst_35 = arith.constant 6.400000e+01 : f32
      %57 = vector.broadcast %cst_35 : f32 to vector<8x1xf32>
      %58 = arith.mulf %57, %56 : vector<8x1xf32>
      %59 = math.exp %58 : vector<8x1xf32>
      %60 = arith.addf %59, %40 : vector<8x1xf32>
      %61 = math.log %60 : vector<8x1xf32>
      %62 = arith.subf %58, %61 : vector<8x1xf32>
      %c8_i32 = arith.constant 8 : i32
      %63 = arith.muli %arg0, %c8_i32 : i32
      %64 = tpu.iota {dimensions = array<i32: 0>} : vector<8x1xi32>
      %65 = vector.broadcast %63 : i32 to vector<8x1xi32>
      %66 = arith.addi %65, %64 : vector<8x1xi32>
      %c13_i32 = arith.constant 13 : i32
      %67 = vector.broadcast %c13_i32 : i32 to vector<8x1xi32>
      %68 = arith.cmpi slt, %66, %67 : vector<8x1xi32>
      %cst_36 = arith.constant 0.000000e+00 : f32
      %69 = vector.broadcast %cst_36 : f32 to vector<8x1xf32>
      %70 = arith.select %68, %62, %69 : vector<8x1xi1>, vector<8x1xf32>
      %71 = vector.shape_cast %70 : vector<8x1xf32> to vector<8x1xf32>
      %72 = vector.broadcast %71 : vector<8x1xf32> to vector<8x128xf32>
      %c0_37 = arith.constant 0 : index
      %c0_38 = arith.constant 0 : index
      %73 = vector.load %arg6[%c0_37, %c0_38] : memref<8x128xf32, #tpu.memory_space<vmem>>, vector<8x128xf32>
      tpu.vector_store %arg6[%c0_37, %c0_38], %72 {strides = array<i32>} : memref<8x128xf32, #tpu.memory_space<vmem>>, vector<8x128xf32>,
    } else {
    }
    return
  }
  func.func @transform_0(%arg0: i32, %arg1: i32) -> (i32, i32) {
    %c0_i32 = arith.constant 0 : i32
    %c0_i32_0 = arith.constant 0 : i32
    return %arg0, %c0_i32 : i32, i32
  }
  func.func @transform_1(%arg0: i32, %arg1: i32) -> (i32, i32) {
    %c0_i32 = arith.constant 0 : i32
    %c0_i32_0 = arith.constant 0 : i32
    return %arg1, %c0_i32 : i32, i32
  }
  func.func @transform_2(%arg0: i32, %arg1: i32) -> (i32, i32) {
    %c0_i32 = arith.constant 0 : i32
    %c0_i32_0 = arith.constant 0 : i32
    return %arg0, %c0_i32 : i32, i32
  }
  func.func @transform_3(%arg0: i32, %arg1: i32) -> (i32, i32) {
    %c0_i32 = arith.constant 0 : i32
    return %arg0, %arg1 : i32, i32
  }
  func.func @transform_4(%arg0: i32, %arg1: i32) -> (i32, i32) {
    %c0_i32 = arith.constant 0 : i32
    %c0_i32_0 = arith.constant 0 : i32
    return %arg0, %c0_i32 : i32, i32
  }
}

</mosaic_0001>

<bundles_post_ra>
// kernel: tpu_custom_call.1
= control target key start
LH: loop header
LB: loop body
LE: loop exit
PB: predicated region body
PF: predicated region fallthrough
CT: control target
= control target key end

     0   :  { %10 = vsyncpa [#allocation6], 0  ;;  %s1372_s0 = inlined_call_operand.vmem [shape: f32[16,64], index: 0, kind: input, shape index: {}]   ;;  %s1373_s1 = inlined_call_operand.vmem [shape: f32[384,64], index: 1, kind: input, shape index: {}]   ;;  %s1374_s2 = inlined_call_operand.vmem [shape: s32[16,1], index: 2, kind: input, shape index: {}]   ;;  %s1375_s3 = inlined_call_operand.hbm [shape: f32[16,384], index: 3, kind: output, shape index: {0}]   ;;  %s1376_s4 = inlined_call_operand.hbm [shape: f32[16,128], index: 4, kind: output, shape index: {1}]  }
   0x1   :  { %12 = vsyncpa [#allocation6 + $0x1], 0 }
   0x2   :  { %13 = vsyncpa [#allocation8], 0 }
   0x3   :  { %15 = vsyncpa [#allocation8 + $0x1], 0  ;;  %s1073_s15 = smov 0   ;;  %s1075_s16 = smov 0  }
   0x4   :  { %s1077_s17 = smov 0   ;;  %s1079_s18 = smov 0  }
   0x5   :  { %s1081_s19 = smov 0   ;;  %s1083_s20 = smov 0  }
   0x6   :  { %s1085_s21 = smov 0   ;;  %s1087_s22 = smov 0  }
   0x7   :  { %s1089_s23 = smov 0   ;;  %s1091_s24 = smov 0  }
   0x8   :  { %s1093_s25 = smov 0  }
   0x9 LB: > { %1387 = sst [smem:[#allocation11_spill]] %s999_s15  ;;  %s648_s26 = sadd.s32 4294967295, %s1039_s25   ;;  %s1039_s25 = sphi %s1093_s25, %s21_s25   ;;  %s1035_s24 = sphi %s1091_s24, %s1416_s24   ;;  %s1031_s23 = sphi %s1089_s23, %s1415_s23   ;;  %s1027_s22 = sphi %s1087_s22, %s1414_s22   ;;  %s1023_s21 = sphi %s1085_s21, %s1413_s21   ;;  %s1019_s20 = sphi %s1083_s20, %s1412_s20   ;;  %s1015_s19 = sphi %s1081_s19, %s1420_s19   ;;  %s1011_s18 = sphi %s1079_s18, %s1419_s18   ;;  %s1007_s17 = sphi %s1077_s17, %s1410_s17   ;;  %s1003_s16 = sphi %s1075_s16, %s1418_s16   ;;  %s999_s15 = sphi %s1073_s15, %s1417_s15  }
   0xa   : > { %1388 = sst [smem:[#allocation12_spill]] %s1007_s17  ;;  %s649_s27 = sadd.s32 4294967294, %s1039_s25  }
   0xb   : > { %1389 = sst [smem:[#allocation13_spill]] %s1019_s20  ;;  %s30_s28 = sadd.s32 1, %s1031_s23 }
   0xc   : > { %1390 = sst [smem:[#allocation14_spill]] %s1031_s23  ;;  %s33_s29 = sadd.s32 1, %s1035_s24 }
   0xd   : > { %1391 = sst [smem:[#allocation15_spill]] %s1035_s24  ;;  %p31_p0 = scmp.ge.s32.totalorder %s30_s28, 3 }
   0xe   : > { %s120_s30 = sadd.s32 1, %s1019_s20  ;;  %p130_p1 = scmp.ne.s32.totalorder %s1019_s20, %s1015_s19 }
   0xf   : > { %p1135_p2 = scmp.eq.s32.totalorder %s648_s26, 5  ;;  %s1422_s28 = smov (%p31_p0, %s30_s28), 0 }
  0x10   : > { %1393 = sst [smem:[#allocation16_spill]] %s1422_s28  ;;  %s1424_s29 = smov (!%p31_p0, %s33_s29), %s1035_s24 }
  0x11   : > { %s116_s6 = ssub.s32 %s1031_s23, %s1422_s28  ;;  %p1146_p3 = por %p1135_p2, %p130_p1 }
  0x12   : > { %p35_p4 = scmp.ge.s32.totalorder %s1424_s29, 2  ;;  %p136_p5 = scmp.ne.s32.totalorder %s1015_s19, %s1011_s18 }
  0x13   : > { %p1152_p6 = scmp.eq.s32.totalorder %s649_s27, 5  ;;  %s146_s9 = sadd.s32 1, %s1007_s17 }
  0x14   : > { %s1426_s29 = smov (%p35_p4, %s1424_s29), 0  ;;  %p156_p8 = scmp.ne.s32.totalorder %s1007_s17, %s1003_s16 }
  0x15   : > { %1396 = sst [smem:[#allocation17_spill]] %s1426_s29  ;;  %p1161_p7 = por %p1152_p6, %p136_p5 }
  0x16   : > { %s115_s11 = ssub.s32 %s1035_s24, %s1426_s29  ;;  %p162_p9 = scmp.ne.s32.totalorder %s1003_s16, %s999_s15 }
  0x17   : > { %s117_s12 = sor.u32 %s116_s6, %s115_s11  ;;  %p144_p10 = scmp.eq.s32.totalorder %s115_s11, 0 }
  0x18   : > { %p118_p11 = scmp.eq.s32.totalorder %s117_s12, 0  ;;  %p1173_p12 = por %p156_p8, %p1135_p2 }
  0x19   : > { %s1178_s14 = scalar_select %p144_p10, %s1007_s17, %s146_s9  }
  0x1a   : > { %s1181_s26 = scalar_select %p118_p11, %s1019_s20, %s120_s30  }
  0x1b   : > { %1399 = sst [smem:[#allocation18_spill]] %s1178_s14  ;;  %p1185_p13 = por %p162_p9, %p1152_p6 }
  0x1c   : > { %1400 = sst [smem:[#allocation19_spill]] %s1181_s26  ;;  %p652_p0 = scmp.ge.s32.totalorder %s1039_s25, 1 }
  0x1d   : > { %s1401_s27 = scalar_select %p1185_p13, 1, 0 }
  0x1e   : > { %p204_p1 = scmp.lt.s32.totalorder %s1039_s25, 7 }
  0x1f   : > { %1402 = sst [smem:[#allocation20_spill]] %s1401_s27 }
  0x20   : > { %p205_p4 = pnand %p652_p0, %p204_p1 }
  0x21   : > { %s1381_s5 = sand.u32 (!%p205_p4), 1, %s1015_s19   ;;  %s1383_s30 = sand.u32 (!%p205_p4), 1, %s1003_s16  }
  0x22   : > { %208 = sbr.rel (%p205_p4) target bundleno = 759 (0x2f7), region = 32  ;;  %s1195_s6 = sshll.u32 (!%p205_p4), %s1381_s5, 3 }
  0x23   : > { %s1199_s8 = sshll.u32 (!%p205_p4), %s1383_s30, 3  ;;  %p243_p2 = scmp.lt.s32.totalorder (!%p205_p4), %s1027_s22, 1 }
  0x24   : > { %s656_s9 = sshll.u32 (!%p205_p4), %s1023_s21, 4  ;;  %p257_p6 = scmp.eq.s32.totalorder (!%p205_p4), %s1023_s21, 0 }
  0x25   : > { %p248_p5 = scmp.lt.s32.totalorder (!%p205_p4), %s656_s9, 47  ;;  %s235_s27 = scalar_lea.vmem (!%p205_p4), [#allocation5], %s1195_s6 }
  0x26   : > { %s242_s15 = scalar_lea.vmem (!%p205_p4), [#allocation7], %s1199_s8  ;;  %p659_p8 = scmp.ne.s32.totalorder (!%p205_p4), %s1023_s21, 0 }
  0x29   : > { %s244_s11 = scalar_select %p243_p2, %s1027_s22, 1 }
  0x2a   : > { %s1428_s9 = smov (!%p248_p5, %s656_s9), 47  ;;  %260 = sbr.rel (%p659_p8) target bundleno = 207 (0xcf), region = 36 }
  0x2b   : > { %s655_s12 = sshll.u32 %s244_s11, 3  ;;  %s657_s23 = sshll.u32 %s1428_s9, 3  ;;  %vm263_vm0 = vcmask (!%p659_p8), 523264   ;;  %v1041_v3 = vmov (!%p659_p8), 0.0  }
  0x2c   : > { %s246_s24 = scalar_lea.vmem %s1372_s0, %s655_s12  ;;  %s1211_s20 = scalar_lea.vmem %s1373_s1, %s657_s23  ;;  %271 = vst [vmem:[#allocation3] sm:$0xff] (!%p659_p8), %v1041_v3  ;;  %272 = vst [vmem:[#allocation4] sm:$0xff] (!%p659_p8), %v1041_v3 }
  0x2d   : > { %s1216_s17 = scalar_lea.vmem %s1374_s2, %s655_s12  ;;  %v261_v0 = vld [vmem:[%s246_s24] sm:$0xff] (!%p659_p8) }
  0x2e   : > { %v262_v1 = vmul.f32 (!%p659_p8), %v261_v0, %v261_v0 }
  0x30   : > { %v264_v2 = vsel (!%p659_p8), %vm263_vm0, %v262_v1, 0.0 }
  0x31   : > { %265 = vadd.xlane.f32.xlu0 %v264_v2 }
  0xbe   : > { %v266_v4 = vpop.xlane.xlu0 %265 }
  0xbf   : > { %v267_v5 = vmax.f32 %v266_v4, 1e-24 }
  0xc1   : > { %878 = vrsqrt.f32 %v267_v5 }
  0xcb   : > { %v879_v6 = vpop.eup %878 }
  0xcc   : > { %v269_v7 = vmul.f32 %v879_v6, %v261_v0 }
  0xce   : > { %270 = vst.msk [vmem:[#allocation2] sm:$0xff] %vm263_vm0, %v269_v7 }
  0xcf PF: > { %p273_p9 = scmp.eq.s32.totalorder %s1027_s22, 0 }
  0xd1   : > { %p274_p10 = pnand %p273_p9, %p257_p6 }
  0xd2   : > { %v278_v8 = vlaneseq (!%p274_p10)  ;;  %vm283_vm1 = vcmask (!%p274_p10), 516096  }
  0xd3   : > { %277 = sbr.rel (%p274_p10) target bundleno = 218 (0xda), region = 40 }
  0xd4   : > { %v279_v9 = vand.u32 (!%p274_p10), 127, %v278_v8 }
  0xd5   : > { %v280_v10 = vld [vmem:[#allocation2] sm:$0x1] (!%p274_p10) }
  0xd6   : > { %vm281_vm2 = vcmp.ge.s32.totalorder (!%p274_p10), %v279_v9, 16 }
  0xd7   : > { %v282_v11 = vsel (!%p274_p10), %vm281_vm2, 0.0, %v280_v10 }
  0xd8   : > { %284 = vst.msk [vmem:[#allocation2] sm:$0x1] (!%p274_p10), %vm283_vm1, %v282_v11 }
  0xda PF: > { %v286_v12 = vld [vmem:[%s1211_s20] sm:$0xff]  ;;  %v287_v13 = vld [vmem:[%s1211_s20 + $0x8] sm:$0xff]  ;;  %vm302_vm3 = vcmask 523264   ;;  %v1042_v14 = vmov 0.0|0.0   ;;  %vm1043_vm5 = vmmov 0   ;;  %v1044_v17 = vmov 0.0  }
  0xdb   : > { %740 = vmatprep.subr.bf16.mxu0 %v1042_v14  ;;  %v741_v15 = vpack.c.bf16 %v287_v13, %v286_v12  ;;  %vm1228_vm4 = vmpackc.low %vm302_vm3, %vm302_vm3  ;;  %737 = vmatprep.mubr.msk.f32.mxu0 %vm1043_vm5, %v1044_v17  ;;  %v1045_v18 = vmov 0   ;;  %v288_v19 = vld [vmem:[%s1211_s20 + $0x10] sm:$0xff]  ;;  %v289_v20 = vld [vmem:[%s1211_s20 + $0x18] sm:$0xff]  ;;  %v427_v42 = vlaneseq  ;;  %p678_p11 = scmp.ne.s32.totalorder %s1023_s21, 2 }
  0xdc   : > { %880 = vset.pattern.permute.xlu0 %v1045_v18  ;;  %v425_v21 = vld [vmem:[%s1216_s17] sm:$0xff]  ;;  %v745_v22 = vpack.c.bf16 %v289_v20, %v288_v19  ;;  %v291_v24 = vld [vmem:[%s1211_s20 + $0x28] sm:$0xff]  ;;  %v292_v26 = vld [vmem:[%s1211_s20 + $0x30] sm:$0xff]  ;;  %s677_s17 = sshll.u32 %s1023_s21, 7 }
  0xdd   : > { %743 = vmatpush3.bf16.xpose.msk.msra.mxu0 %vm1228_vm4, %v741_v15  ;;  %432 = vperm.xlu0 %880, %v425_v21   ;;  %v290_v23 = vld [vmem:[%s1211_s20 + $0x20] sm:$0xff]  ;;  %v293_v27 = vld [vmem:[%s1211_s20 + $0x38] sm:$0xff]  ;;  %v295_v30 = vld [vmem:[%s1211_s20 + $0x48] sm:$0xff]  ;;  %v428_v43 = vand.u32 127, %v427_v42  ;;  %v429_v44 = vstv %s677_s17 }
  0xde   : > { %744 = vmatprep.subr.bf16.mxu0 %v1042_v14  ;;  %v749_v25 = vpack.c.bf16 %v291_v24, %v290_v23  ;;  %v753_v28 = vpack.c.bf16 %v293_v27, %v292_v26  ;;  %v294_v29 = vld [vmem:[%s1211_s20 + $0x40] sm:$0xff]  ;;  %v296_v32 = vld [vmem:[%s1211_s20 + $0x50] sm:$0xff]  ;;  %v297_v33 = vld [vmem:[%s1211_s20 + $0x58] sm:$0xff] }
  0xdf   : > { %v757_v31 = vpack.c.bf16 %v295_v30, %v294_v29  ;;  %v761_v34 = vpack.c.bf16 %v297_v33, %v296_v32  ;;  %v298_v35 = vld [vmem:[%s1211_s20 + $0x60] sm:$0xff]  ;;  %v299_v36 = vld [vmem:[%s1211_s20 + $0x68] sm:$0xff]  ;;  %v300_v38 = vld [vmem:[%s1211_s20 + $0x70] sm:$0xff]  ;;  %v430_v45 = vadd.s32 %v429_v44, %v428_v43 }
  0xe0   : > { %v765_v37 = vpack.c.bf16 %v299_v36, %v298_v35  ;;  %v301_v39 = vld [vmem:[%s1211_s20 + $0x78] sm:$0xff]  ;;  %v285_v41 = vld [vmem:[#allocation2] sm:$0xff]  ;;  %v441_v47 = vld [vmem:[#allocation4] sm:$0xff]  ;;  %s681_s20 = sshll.u32 (!%p678_p11), %s1027_s22, 3 }
  0xe1   : > { %v769_v40 = vpack.c.bf16 %v301_v39, %v300_v38  ;;  %v440_v54 = vld [vmem:[#allocation3] sm:$0xff]  ;;  %v481_v15 = vstv (!%p678_p11), %s681_s20 }
  0xe5   : > { %747 = vmatpush3.bf16.xpose.msk.msra.mxu0 %vm1228_vm4, %v745_v22 }
  0xe6   : > { %748 = vmatprep.subr.bf16.mxu0 %v1042_v14 }
  0xed   : > { %751 = vmatpush3.bf16.xpose.msk.msra.mxu0 %vm1228_vm4, %v749_v25 }
  0xee   : > { %752 = vmatprep.subr.bf16.mxu0 %v1042_v14 }
  0xf5   : > { %755 = vmatpush3.bf16.xpose.msk.msra.mxu0 %vm1228_vm4, %v753_v28 }
  0xf6   : > { %756 = vmatprep.subr.bf16.mxu0 %v1042_v14 }
  0xfd   : > { %759 = vmatpush3.bf16.xpose.msk.msra.mxu0 %vm1228_vm4, %v757_v31 }
  0xfe   : > { %760 = vmatprep.subr.bf16.mxu0 %v1042_v14 }
 0x105   : > { %763 = vmatpush3.bf16.xpose.msk.msra.mxu0 %vm1228_vm4, %v761_v34 }
 0x106   : > { %764 = vmatprep.subr.bf16.mxu0 %v1042_v14 }
 0x10d   : > { %767 = vmatpush3.bf16.xpose.msk.msra.mxu0 %vm1228_vm4, %v765_v37 }
 0x10e   : > { %768 = vmatprep.subr.bf16.mxu0 %v1042_v14  ;;  %v480_v14 = vshrl.u32 (!%p678_p11), %v427_v42, 7 }
 0x110   : > { %v482_v16 = vadd.s32 (!%p678_p11), %v481_v15, %v480_v14 }
 0x112   : > { %vm483_vm9 = vcmp.lt.s32.totalorder (!%p678_p11), %v482_v16, 13 }
 0x115   : > { %771 = vmatpush3.bf16.xpose.msk.msra.mxu0 %vm1228_vm4, %v769_v40 }
 0x11c   : > { %738 = vmatmul.mubr.msk.f32.vlgmr.msra.gmra.mrb[0].mxu0 %vm302_vm3, %v285_v41 }
 0x15c   : > { %v433_v46 = vpop.permute.xlu0 %432 }
 0x15d   : > { %vm434_vm6 = vcmp.eq.s32.totalorder %v430_v45, %v433_v46 }
 0x1ef   : > { %v420_v48 = vpop.f32.mrb[0].mxu0 }
 0x1f0   : > { %424 = vst [vmem:[%s235_s27] sm:$0xff] %v420_v48  ;;  %v435_v49 = vmul.f32 64.0, %v420_v48  ;;  %v439_v50 = vsel %vm434_vm6, %v420_v48, 0.0  ;;  %v739_v51 = vpop.f32.mrb[1].mxu0 }
 0x1f1   : > { %v443_v52 = vadd.f32 %v441_v47, %v439_v50 }
 0x1f2   : > { %v436_v53 = vmul.f32 1.442695, %v435_v49 }
 0x1f3   : > { %445 = vst [vmem:[#allocation4] sm:$0xff] %v443_v52 }
 0x1f4   : > { %881 = vpow2.f32 %v436_v53 }
 0x1fa   : > { %v454_v58 = vld [vmem:[#allocation4] sm:$0xff] (!%p678_p11) }
 0x1fb   : > { %455 = vadd.xlane.f32.xlu0 (!%p678_p11), %v454_v58 }
 0x1fc   : > { %449 = sbr.rel (%p678_p11) target bundleno = 708 (0x2c4), region = 44 }
 0x1fe   : > { %v882_v55 = vpop.eup %881 }
 0x1ff   : > { %v438_v56 = vsel %vm434_vm6, 0.0, %v882_v55 }
 0x200   : > { %v442_v57 = vadd.f32 %v440_v54, %v438_v56 }
 0x202   : > { %444 = vst [vmem:[#allocation3] sm:$0xff] %v442_v57 }
 0x209   : > { %v450_v59 = vld [vmem:[#allocation3] sm:$0xff] }
 0x20a   : > { %451 = vadd.xlane.f32.xlu0 %v450_v59 }
 0x288   : > { %v456_v60 = vpop.xlane.xlu0 %455 }
 0x289   : > { %v680_v61 = vclamps-f32 %v456_v60, 0.9999999 }
 0x28b   : > { %v460_v62 = vmul.f32 %v680_v61, %v680_v61  ;;  %v459_v5 = vmul.f32 0.87758255, %v680_v61 }
 0x28d   : > { %v461_v63 = vsub.f32 1.0, %v460_v62 }
 0x28f   : > { %883 = vrsqrt.f32 %v461_v63  ;;  %vm464_vm7 = vcmp.eq.f32.partialorder %v461_v63, inf  ;;  %v467_v2 = vand.u32 2147483648, %v461_v63  ;;  %vm466_vm8 = vcmp.eq.f32.partialorder %v461_v63, 0.0 }
 0x297   : > { %v452_v10 = vpop.xlane.xlu0 %451 }
 0x298   : > { %v679_v11 = vadd.f32 -84.0, %v452_v10 }
 0x299   : > { %v884_v0 = vpop.eup %883 }
 0x29a   : > { %v463_v1 = vmul.f32 %v884_v0, %v461_v63 }
 0x29c   : > { %v465_v3 = vsel %vm464_vm7, %v461_v63, %v463_v1 }
 0x29d   : > { %v468_v4 = vsel %vm466_vm8, %v467_v2, %v465_v3 }
 0x29e   : > { %v469_v6 = vmul.f32 0.47942555, %v468_v4 }
 0x2a0   : > { %v470_v7 = vsub.f32 %v459_v5, %v469_v6 }
 0x2a2   : > { %v471_v8 = vmul.f32 64.0, %v470_v7 }
 0x2a4   : > { %v472_v9 = vmul.f32 1.442695, %v471_v8 }
 0x2a6   : > { %885 = vpow2.f32 %v472_v9 }
 0x2b0   : > { %v886_v12 = vpop.eup %885 }
 0x2b1   : > { %v474_v13 = vadd.f32 %v886_v12, %v679_v11 }
 0x2b3   : > { %887 = vlog2.f32 %v474_v13 }
 0x2bd   : > { %v888_v17 = vpop.eup %887 }
 0x2be   : > { %v476_v18 = vmul.f32 0.6931472, %v888_v17 }
 0x2c0   : > { %v477_v19 = vsub.f32 %v471_v8, %v476_v18 }
 0x2c2   : > { %v484_v20 = vsel %vm483_vm9, %v477_v19, 0.0 }
 0x2c3   : > { %485 = vst [vmem:[%s242_s15] sm:$0xff] %v484_v20 }
 0x2c4 PF: > { %s772_s23 = smul.u32 3, %s1027_s22  ;;  %s507_s24 = sshll.u32 %s235_s27, 4  ;;  %s1275_s24 = int_to_ptr.vmem [resolvable:$true] %s507_s24 }
 0x2c5   : > { %s685_s14 = sshll.u32 %s1027_s22, 7  ;;  %s1405_s6 = sand.u32 1, %s1015_s19  }
 0x2c6   : > { %s503_s28 = sadd.s32 %s1023_s21, %s772_s23  ;;  %s1286_s12 = scalar_lea.hbm %s1376_s4, %s685_s14 }
 0x2c7   : > { %s684_s29 = sshll.u32 %s503_s28, 7  ;;  %s487_s27 = scalar_lea.sflag [#allocation6], %s1405_s6 }
 0x2c8   : > { %s1281_s30 = scalar_lea.hbm %s1375_s3, %s684_s29  ;;  %s889_s21 = scalar_lea.vmem %s1275_s24, 128 }
 0x2c9   : > { %p890_p0 = scmp.ne.s32.totalorder %s1275_s24, %s889_s21  ;;  %s1046_s17 = smov [#allocation5]  }
 0x2ca   : > { %s893_s20 = sshll.u32 %s1046_s17, 4  ;;  %s894_s20 = int_to_ptr.vmem [resolvable:$false] %s893_s20 }
 0x2cb   : > { %p891_p1 = pnand %p890_p0, %p1146_p3  ;;  %s895_s22 = scalar_lea.vmem %s894_s20, 256 }
 0x2cc   : > { %p896_p2 = scmp.lt.s32.totalorder %s1275_s24, %s894_s20  ;;  %p897_p5 = scmp.lt.s32.totalorder %s895_s22, %s889_s21 }
 0x2cd   : > { %p892_p4 = pneg %p891_p1 }
 0x2ce   : > { %p898_p6 = por %p897_p5, %p896_p2 }
 0x2d0   : > { %p899_p8 = pnand %p898_p6, %p892_p4 }
 0x2d2   : > { %902 = shalt.err (!%p899_p8)
}
 0x2d3   : > { %s903_s23 = scalar_lea.hbm %s1281_s30, 128  ;;  %s907_s14 = scalar_lea.hbm %s1375_s3, 768 }
 0x2d4   : > { %p904_p9 = scmp.ne.s32.totalorder %s1281_s30, %s903_s23  ;;  %p908_p0 = scmp.lt.u32.totalorder %s1281_s30, %s1375_s3 }
 0x2d5   : > { %p909_p1 = scmp.lt.u32.totalorder %s907_s14, %s903_s23  ;;  %p911_p2 = scmp.lt.u32.totalorder %s903_s23, %s1281_s30 }
 0x2d6   : > { %p905_p10 = pnand %p904_p9, %p1146_p3 }
 0x2d7   : > { %p910_p4 = por %p909_p1, %p908_p0 }
 0x2d8   : > { %p906_p11 = pneg %p905_p10 }
 0x2d9   : > { %p912_p5 = por %p911_p2, %p910_p4 }
 0x2db   : > { %p913_p6 = pnand %p912_p5, %p906_p11 }
 0x2dd   : > { %916 = shalt.err (!%p913_p6)
}
 0x2de   : > { %773 = dma.vmem_to_hbm [thread:$0]  (%p1146_p3), %s1275_s24, 128, %s1281_s30, %s487_s27  }
 0x2df   : > { %s520_s9 = sshll.u32 %s242_s15, 4  ;;  %s1406_s11 = sand.u32 1, %s1003_s16   ;;  %s521_s9 = int_to_ptr.vmem [resolvable:$true] %s520_s9 }
 0x2e0   : > { %s492_s6 = scalar_lea.sflag [#allocation8], %s1406_s11  ;;  %s917_s21 = scalar_lea.vmem %s521_s9, 128 }
 0x2e1   : > { %p918_p8 = scmp.ne.s32.totalorder %s521_s9, %s917_s21  ;;  %s1047_s17 = smov [#allocation7]  }
 0x2e2   : > { %s921_s20 = sshll.u32 %s1047_s17, 4  ;;  %s922_s20 = int_to_ptr.vmem [resolvable:$false] %s921_s20 }
 0x2e3   : > { %p919_p9 = pnand %p918_p8, %p1173_p12  ;;  %s923_s7 = scalar_lea.vmem %s922_s20, 256 }
 0x2e4   : > { %p924_p11 = scmp.lt.s32.totalorder %s521_s9, %s922_s20  ;;  %p925_p0 = scmp.lt.s32.totalorder %s923_s7, %s917_s21 }
 0x2e5   : > { %p920_p10 = pneg %p919_p9 }
 0x2e6   : > { %p926_p1 = por %p925_p0, %p924_p11 }
 0x2e8   : > { %p927_p4 = pnand %p926_p1, %p920_p10 }
 0x2ea   : > { %930 = shalt.err (!%p927_p4)
}
 0x2eb   : > { %s931_s15 = scalar_lea.hbm %s1286_s12, 128  ;;  %s935_s30 = scalar_lea.hbm %s1376_s4, 256 }
 0x2ec   : > { %p932_p3 = scmp.ne.s32.totalorder %s1286_s12, %s931_s15  ;;  %p936_p6 = scmp.lt.u32.totalorder %s1286_s12, %s1376_s4 }
 0x2ed   : > { %p937_p8 = scmp.lt.u32.totalorder %s935_s30, %s931_s15  ;;  %p939_p10 = scmp.lt.u32.totalorder %s931_s15, %s1286_s12 }
 0x2ee   : > { %p933_p2 = pnand %p932_p3, %p1173_p12 }
 0x2ef   : > { %p938_p9 = por %p937_p8, %p936_p6 }
 0x2f0   : > { %p934_p5 = pneg %p933_p2 }
 0x2f1   : > { %p940_p11 = por %p939_p10, %p938_p9 }
 0x2f3   : > { %p941_p0 = pnand %p940_p11, %p934_p5 }
 0x2f5   : > { %944 = shalt.err (!%p941_p0)
}
 0x2f6   : > { %774 = dma.vmem_to_hbm [thread:$0]  (%p1173_p12), %s521_s9, 128, %s1286_s12, %s492_s6  }
 0x2f7 PF: > { %p784_p1 = scmp.ge.s32.totalorder %s1039_s25, 2  ;;  %s532_s23 = sand.u32 1, %s1011_s18  }
 0x2f8   : > { %s533_s28 = scalar_lea.sflag [#allocation6], %s532_s23 }
 0x2f9   : > { %p778_p4 = pnand %p784_p1, %p1161_p7 }
 0x2fb   : > { %990 = dma.done.wait (!%p778_p4), %s533_s28, 128  }
 0x2fc   : > { %992 = vsyncadd (!%p778_p4), %s533_s28, 4294967168  ;;  %s1407_s29 = sld [smem:[#allocation11_spill]]  ;;  %p781_p3 = pnand %p784_p1, %p1185_p13 }
 0x302   : > { %s541_s26 = sand.u32 1, %s1407_s29  }
 0x303   : > { %s542_s5 = scalar_lea.sflag [#allocation8], %s541_s26 }
 0x304   : > { %994 = dma.done.wait (!%p781_p3), %s542_s5, 128  }
 0x305   : > { %996 = vsyncadd (!%p781_p3), %s542_s5, 4294967168  ;;  %s21_s25 = sadd.s32 1, %s1039_s25   ;;  %s1409_s13 = sld [smem:[#allocation12_spill]] }
 0x306   : > { %p18_p12 = scmp.ge.s32.totalorder %s21_s25, 8   ;;  %s1410_s17 = sld [smem:[#allocation18_spill]] }
 0x307   : > { %s1411_s10 = sld [smem:[#allocation13_spill]]  ;;  %s1412_s20 = sld [smem:[#allocation19_spill]] }
 0x308   : > { %s1413_s21 = sld [smem:[#allocation14_spill]]  ;;  %s1414_s22 = sld [smem:[#allocation15_spill]] }
 0x309   : > { %s1415_s23 = sld [smem:[#allocation16_spill]]  ;;  %s1416_s24 = sld [smem:[#allocation17_spill]] }
 0x30a   : > { %s1417_s15 = smov %s1003_s16  ;;  %s1419_s18 = smov %s1015_s19 }
 0x30b   : > { %s1418_s16 = smov %s1409_s13  ;;  %20 = sbr.rel (!%p18_p12) target bundleno = 9 (0x9), region = 102 }
 0x30d   : > { %s1420_s19 = smov %s1411_s10 }
 0x312   :  { %547 = vsyncpa [#allocation6], 1 }
 0x313   :  { %549 = vsyncpa [#allocation6 + $0x1], 1 }
 0x314   :  { %550 = vsyncpa [#allocation8], 1 }
 0x315   :  { %552 = vsyncpa [#allocation8 + $0x1], 1 }

</bundles_post_ra>
